<compile_context>
chip_gen: v5e
topology: v5e:2x2
jax: 0.10.0
libtpu: 0.0.40
codegen_flags: <defaults>
</compile_context>

<pallas_src>
import jax
import jax.numpy as jnp
from jax.experimental import pallas as pl
from jax.experimental.pallas import tpu as pltpu


def _constant_input_kernel(const_ref, out_ref):
    # const_ref: (tr, lanes)      one lane-dense row-tile of the constant slab
    # out_ref:   (bt, tr, lanes)  same tile replicated over a batch tile
    out_ref[...] = jnp.broadcast_to(const_ref[...][None], out_ref.shape)


def _choose_layout(S, C, max_lanes=1024):
    """Regroup the (S, C) constant into (rows, lanes) with lanes % 128 == 0.

    Returns None when no lane-dense regrouping exists (S*C not divisible by
    128); the wrapper then falls back to a fused XLA broadcast instead of
    paying masked partial stores at C/128 lane occupancy.
    """
    total = S * C
    if total % 128 != 0:
        return None
    m = total // 128
    lanes = 128
    # Widest lane dim (multiple of 128, divides total) that still leaves >= 8 rows.
    for k in range(max_lanes // 128, 0, -1):
        if m % k == 0 and (total // (128 * k)) >= 8:
            lanes = 128 * k
            break
    return total // lanes, lanes


def _vmem_budget():
    """(scoped vmem limit to request, byte budget for the double-buffered tiles)."""
    try:
        cap = pltpu.get_tpu_info().vmem_capacity_bytes  # 128 MiB v5e/v6e, 64 MiB v7x
    except Exception:
        cap = 64 << 20
    limit = int(min(cap // 2, 64 << 20))
    return limit, (limit * 3) // 4


def _choose_tiles(B, rows, lanes, itemsize, budget):
    """Pick (bt, tr): batch-fold factor and row tile, kept inside the VMEM budget."""
    unit = lanes * itemsize                       # bytes per lane-dense row

    def max_tr(bt):
        # double-buffered input tile + double-buffered (batch-folded) output tile
        t = budget // (2 * (bt + 1) * unit)
        return (t // 8) * 8

    need = min(8, rows)
    bt = 1
    for cand in range(B, 0, -1):                  # prefer folding the whole batch
        if B % cand == 0 and budget // (2 * (cand + 1) * unit) >= need:
            bt = cand
            break

    if rows <= 8:
        tr = rows                                 # block dim == full dim: legal
    else:
        tr = min(rows, max(8, max_tr(bt)))
        # Megacore (v7x has 2 TCs): keep >= 2 parallel grid steps when splittable.
        if (B // bt) * pl.cdiv(rows, tr) < 2:
            tr = max(8, ((pl.cdiv(rows, 2) + 7) // 8) * 8)
    return bt, tr


def constant_input(w, constant, *, force_pallas=False, min_pallas_bytes=1 << 20):
    """Forward of CIPS ConstantInput: constant.repeat(B, 1, 1).

    w: (B, w_dim) latent -- only its batch size is used.
    constant: (1, S, C) learned parameter.
    """
    B = w.shape[0]
    _, S, C = constant.shape
    out_bytes = B * S * C * constant.dtype.itemsize

    layout = _choose_layout(S, C)
    if layout is None or (not force_pallas and out_bytes < min_pallas_bytes):
        # Tiny outputs / non-lane-dense shapes: let XLA fuse the broadcast into
        # the consumer (avoids materializing B copies to HBM at all).
        return jnp.broadcast_to(constant, (B, S, C))

    rows, lanes = layout
    const2d = constant.reshape(rows, lanes)       # zero-cost row-major regroup
    limit, budget = _vmem_budget()
    bt, tr = _choose_tiles(B, rows, lanes, const2d.dtype.itemsize, budget)

    out = pl.pallas_call(
        _constant_input_kernel,
        out_shape=jax.ShapeDtypeStruct((B, rows, lanes), const2d.dtype),
        # Row tiles outer, batch tiles inner: the constant's block index is
        # unchanged across consecutive steps, so Pallas skips re-fetching it.
        grid=(pl.cdiv(rows, tr), B // bt),
        in_specs=[pl.BlockSpec((tr, lanes), lambda r, b: (r, 0))],
        out_specs=pl.BlockSpec((bt, tr, lanes), lambda r, b: (b, r, 0)),
        compiler_params=pltpu.CompilerParams(
            dimension_semantics=("parallel", "parallel"),
            vmem_limit_bytes=limit),
    )(const2d)

    return out.reshape(B, S, C)


def _reference(w, constant):
    """Pure-JAX reference mirroring the PyTorch forward (constant.repeat(B,1,1))."""
    B = w.shape[0]
    _, S, C = constant.shape
    return jnp.broadcast_to(constant, (B, S, C))


if __name__ == "__main__":
    channels, size = 4, 16
    B, w_dim = 2, 32
    S = size * size

    key = jax.random.PRNGKey(0)
    k_const, k_latent = jax.random.split(key, 2)
    # Deterministic "randn" parameter init matching the module's shapes.
    constant = jax.random.normal(k_const, (1, S, channels), jnp.float32)  # nn.Parameter
    w = jax.random.normal(k_latent, (B, w_dim), jnp.float32)              # latent (batch only)

    out = constant_input(w, constant, force_pallas=True)  # exercise the Pallas path
    out = jax.block_until_ready(out)

    ref = _reference(w, constant)
    assert out.shape == (B, S, channels), out.shape
    assert jnp.array_equal(out, ref), float(jnp.max(jnp.abs(out - ref)))

    print("KERNEL_OK")
</pallas_src>

<mosaic_0001>
module attributes {stable_mosaic.version = 11 : i64} {
  func.func @_constant_input_kernel(%arg0: i32, %arg1: i32, %arg2: memref<8x128xf32, #tpu.memory_space<vmem>>, %arg3: memref<2x8x128xf32, #tpu.memory_space<vmem>>) attributes {dimension_semantics = [#tpu.dimension_semantics<parallel>, #tpu.dimension_semantics<parallel>], iteration_bounds = array<i64: 1, 1>, scalar_prefetch = 0 : i64, scratch_operands = 0 : i64, tpu.core_type = #tpu.core_type<tc>, window_params = [{transform_indices = @transform_0, window_bounds = array<i64: 8, 128>}, {transform_indices = @transform_1, window_bounds = array<i64: 2, 8, 128>}]} {
    %c0 = arith.constant 0 : index
    %c0_0 = arith.constant 0 : index
    %0 = vector.load %arg2[%c0, %c0_0] : memref<8x128xf32, #tpu.memory_space<vmem>>, vector<8x128xf32>
    %1 = vector.shape_cast %0 : vector<8x128xf32> to vector<1x8x128xf32>
    %2 = vector.shape_cast %1 : vector<1x8x128xf32> to vector<1x8x128xf32>
    %3 = vector.broadcast %2 : vector<1x8x128xf32> to vector<2x8x128xf32>
    %c0_1 = arith.constant 0 : index
    %c0_2 = arith.constant 0 : index
    %c0_3 = arith.constant 0 : index
    %4 = vector.load %arg3[%c0_1, %c0_2, %c0_3] : memref<2x8x128xf32, #tpu.memory_space<vmem>>, vector<2x8x128xf32>
    tpu.vector_store %arg3[%c0_1, %c0_2, %c0_3], %3 {strides = array<i32>} : memref<2x8x128xf32, #tpu.memory_space<vmem>>, vector<2x8x128xf32>,
    return
  }
  func.func @transform_0(%arg0: i32, %arg1: i32) -> (i32, i32) {
    %c0_i32 = arith.constant 0 : i32
    %c0_i32_0 = arith.constant 0 : i32
    return %arg0, %c0_i32 : i32, i32
  }
  func.func @transform_1(%arg0: i32, %arg1: i32) -> (i32, i32, i32) {
    %c0_i32 = arith.constant 0 : i32
    %c0_i32_0 = arith.constant 0 : i32
    return %arg1, %arg0, %c0_i32 : i32, i32, i32
  }
}

</mosaic_0001>

<bundles_post_ra>
// kernel: tpu_custom_call.1
= control target key start
LH: loop header
LB: loop body
LE: loop exit
PB: predicated region body
PF: predicated region fallthrough
CT: control target
= control target key end

     0   :  { %6 = vsyncpa [#allocation3], 0  ;;  %s121_s0 = inlined_call_operand.hbm [shape: f32[8,128], index: 0, kind: input, shape index: {}]   ;;  %s122_s1 = inlined_call_operand.hbm [shape: f32[2,8,128], index: 1, kind: output, shape index: {}]  }
   0x1   :  { %7 = vsyncpa [#allocation4], 0  ;;  %s13_s8 = sshll.u32 %s121_s0, 4  ;;  %s101_s9 = smov [#allocation2]   ;;  %s14_s8 = int_to_ptr.hbm [resolvable:$true] %s13_s8 }
   0x2   :  { %s15_s10 = sshll.u32 %s101_s9, 4  ;;  %s16_s10 = int_to_ptr.vmem [resolvable:$true] %s15_s10 }
   0x3   :  { %18 = dma.hbm_to_vmem [thread:$0]  %s14_s8, 128, %s16_s10, [#allocation3]  }
   0x4   :  { %97 = dma.done.wait [#allocation3], 128  }
   0x5   :  { %98 = vsyncadd [#allocation3], 4294967168  ;;  %s102_s11 = smov [#allocation5]   ;;  %s32_s15 = sshll.u32 %s122_s1, 4  ;;  %v23_v0 = vld [vmem:[#allocation2] sm:$0xff]  ;;  %s33_s15 = int_to_ptr.hbm [resolvable:$true] %s32_s15 }
   0x6   :  { %s30_s12 = sshll.u32 %s102_s11, 4  ;;  %24 = vst [vmem:[#allocation5] sm:$0xff] %v23_v0  ;;  %s103_s16 = smov 128   ;;  %s31_s12 = int_to_ptr.vmem [resolvable:$true] %s30_s12 }
   0x7   :  { %25 = vst [vmem:[#allocation5 + $0x8] sm:$0xff] %v23_v0  ;;  %s104_s0 = smov 8  }
   0x8   :  { %38 = dma.vmem_to_hbm [thread:$0]  %s31_s12, 256, %s33_s15, [#allocation4], %s103_s16, %s103_s16, %s104_s0  }
   0x9   :  { %99 = dma.done.wait [#allocation4], 256  }
   0xa   :  { %100 = vsyncadd [#allocation4], 4294967040 }
   0xb   :  { %43 = vsyncpa [#allocation3], 1 }
   0xc   :  { %44 = vsyncpa [#allocation4], 1 }

</bundles_post_ra>
